<compile_context>
chip_gen: v5e
topology: v5e:2x2
jax: 0.10.0
libtpu: 0.0.40
codegen_flags: <defaults>
</compile_context>

<pallas_src>
import math

import jax
import jax.numpy as jnp
from jax import lax
from jax.experimental import pallas as pl
from jax.experimental.pallas import tpu as pltpu


def _make_kernel(num_heads, head_dim, block_b, Lq, Lk, E):
    scale = 1.0 / math.sqrt(head_dim)

    def kernel(q_ref, k_ref, wq_ref, wk_ref, wv_ref,
               bq_ref, bk_ref, bv_ref, wo_ref, bo_ref, out_ref):
        # ---- batched input projections: all block_b batch elements at once ----
        # Feed native dtype straight to the MXU; accumulate in f32.
        q2 = q_ref[...].reshape(block_b * Lq, E)   # (Bb*Lq, E)
        k2 = k_ref[...].reshape(block_b * Lk, E)   # (Bb*Lk, E)

        qp = jnp.dot(q2, wq_ref[...], preferred_element_type=jnp.float32) + bq_ref[...]
        kp = jnp.dot(k2, wk_ref[...], preferred_element_type=jnp.float32) + bk_ref[...]
        vp = jnp.dot(k2, wv_ref[...], preferred_element_type=jnp.float32) + bv_ref[...]

        # Fold the 1/sqrt(Dh) scale into q once (Lq*E mults vs H*Lq*Lk on s).
        qp = qp * scale

        qp = qp.reshape(block_b, Lq, E)
        kp = kp.reshape(block_b, Lk, E)
        vp = vp.reshape(block_b, Lk, E)

        # ---- attention, head by head, accumulating the output projection ----
        acc = jnp.zeros((block_b, Lq, E), jnp.float32)
        for h in range(num_heads):
            lo = h * head_dim
            hi = lo + head_dim
            qh = qp[:, :, lo:hi]   # (Bb, Lq, Dh)
            kh = kp[:, :, lo:hi]   # (Bb, Lk, Dh)
            vh = vp[:, :, lo:hi]   # (Bb, Lk, Dh)

            # q @ k^T with no explicit transpose: contract last dims, batch over Bb.
            s = lax.dot_general(
                qh, kh,
                dimension_numbers=(((2,), (2,)), ((0,), (0,))),
                preferred_element_type=jnp.float32)              # (Bb, Lq, Lk)
            s = s - jnp.max(s, axis=-1, keepdims=True)
            p = jnp.exp(s)

            # Unnormalized PV, then one cheap (Lq, Dh) rescale instead of
            # normalizing the whole (Lq, Lk) probability matrix.
            o_h = lax.dot_general(
                p, vh,
                dimension_numbers=(((2,), (1,)), ((0,), (0,))),
                preferred_element_type=jnp.float32)              # (Bb, Lq, Dh)
            inv = pl.reciprocal(jnp.sum(p, axis=-1, keepdims=True), approx=True)
            o_h = o_h * inv

            # Accumulate directly into the output projection: acc += o_h @ Wo[lo:hi, :]
            acc = acc + lax.dot_general(
                o_h, wo_ref[lo:hi, :],
                dimension_numbers=(((2,), (0,)), ((), ())),
                preferred_element_type=jnp.float32)              # (Bb, Lq, E)

        out_ref[...] = (acc + bo_ref[...]).astype(out_ref.dtype)

    return kernel


def _pick_block_b(B, Lq, Lk, E, itemsize):
    """Largest divisor of B whose per-step working set stays well inside VMEM."""
    per_b = 2 * (Lq + Lk) * E * itemsize          # q/k input blocks (double-buffered)
    per_b += 2 * Lq * E * itemsize                # output block (double-buffered)
    per_b += (Lq + 2 * Lk + 2 * Lq) * E * 4       # qp/kp/vp + acc/scratch in f32
    budget = 32 * 1024 * 1024                     # conservative (fits v7x's 64 MiB VMEM)
    target = max(1, budget // max(per_b, 1))
    bb = 1
    for d in range(1, B + 1):
        if B % d == 0 and d <= target:
            bb = d
    return bb


def multi_cross_att(query, key, params, num_heads, block_b=None):
    """query: (B, Lq, E), key: (B, Lk, E).  Returns attn_output (B, Lq, E)."""
    B, Lq, E = query.shape
    _, Lk, _ = key.shape
    assert E % num_heads == 0
    head_dim = E // num_heads

    if block_b is None:
        block_b = _pick_block_b(B, Lq, Lk, E, jnp.dtype(query.dtype).itemsize)
    assert B % block_b == 0, "block_b must divide B"

    # Pre-transpose weights to (in, out); biases as (1, E) for TPU-friendly 2-D layout.
    wq_t = params["wq"].T
    wk_t = params["wk"].T
    wv_t = params["wv"].T
    wo_t = params["wo"].T
    bq = params["bq"].reshape(1, E)
    bk = params["bk"].reshape(1, E)
    bv = params["bv"].reshape(1, E)
    bo = params["bo"].reshape(1, E)

    kernel = _make_kernel(num_heads, head_dim, block_b, Lq, Lk, E)

    # NOTE: weight/bias blocks are grid-invariant; Pallas does not re-DMA them.
    # TODO(synk): for very large E/Lq on v7x, add an Lq-tile grid axis and
    # single-buffer the weight blocks (pipeline_mode=pl.Buffered(1)).
    full2d = lambda b: (0, 0)
    grid_spec = pltpu.PrefetchScalarGridSpec(
        num_scalar_prefetch=0,
        grid=(B // block_b,),
        in_specs=[
            pl.BlockSpec((block_b, Lq, E), lambda b: (b, 0, 0)),   # query
            pl.BlockSpec((block_b, Lk, E), lambda b: (b, 0, 0)),   # key (= value source)
            pl.BlockSpec((E, E), full2d),                          # Wq^T
            pl.BlockSpec((E, E), full2d),                          # Wk^T
            pl.BlockSpec((E, E), full2d),                          # Wv^T
            pl.BlockSpec((1, E), full2d),                          # bq
            pl.BlockSpec((1, E), full2d),                          # bk
            pl.BlockSpec((1, E), full2d),                          # bv
            pl.BlockSpec((E, E), full2d),                          # Wo^T
            pl.BlockSpec((1, E), full2d),                          # bo
        ],
        out_specs=pl.BlockSpec((block_b, Lq, E), lambda b: (b, 0, 0)),
    )

    return pl.pallas_call(
        kernel,
        out_shape=jax.ShapeDtypeStruct((B, Lq, E), query.dtype),
        grid_spec=grid_spec,
        compiler_params=pltpu.CompilerParams(
            dimension_semantics=("parallel",)),   # batch blocks are fully independent
    )(query, key, wq_t, wk_t, wv_t, bq, bk, bv, wo_t, bo)


def init_params(key, hidden_dim):
    """Deterministic synthetic init matching nn.MultiheadAttention param shapes."""
    ks = jax.random.split(key, 2)
    bound = 1.0 / math.sqrt(hidden_dim)
    in_proj_w = jax.random.uniform(ks[0], (3 * hidden_dim, hidden_dim),
                                   jnp.float32, -bound, bound)
    wq, wk, wv = jnp.split(in_proj_w, 3, axis=0)
    in_proj_b = jnp.zeros((3 * hidden_dim,), jnp.float32)
    bq, bk, bv = jnp.split(in_proj_b, 3)
    wo = jax.random.uniform(ks[1], (hidden_dim, hidden_dim), jnp.float32, -bound, bound)
    bo = jnp.zeros((hidden_dim,), jnp.float32)
    return {"wq": wq, "wk": wk, "wv": wv, "bq": bq, "bk": bk, "bv": bv,
            "wo": wo, "bo": bo}


def reference_multi_cross_att(query, key, params, num_heads):
    """Pure-JAX reference (mirrors torch F.multi_head_attention_forward)."""
    B, Lq, E = query.shape
    _, Lk, _ = key.shape
    Dh = E // num_heads
    q = query @ params["wq"].T + params["bq"]
    k = key @ params["wk"].T + params["bk"]
    v = key @ params["wv"].T + params["bv"]
    q = q.reshape(B, Lq, num_heads, Dh).transpose(0, 2, 1, 3)
    k = k.reshape(B, Lk, num_heads, Dh).transpose(0, 2, 1, 3)
    v = v.reshape(B, Lk, num_heads, Dh).transpose(0, 2, 1, 3)
    s = jnp.einsum("bhqd,bhkd->bhqk", q, k) / math.sqrt(Dh)
    p = jax.nn.softmax(s, axis=-1)
    o = jnp.einsum("bhqk,bhkd->bhqd", p, v)
    o = o.transpose(0, 2, 1, 3).reshape(B, Lq, E)
    return o @ params["wo"].T + params["bo"]


if __name__ == "__main__":
    hidden_dim = 32
    num_heads = 4
    B, Lq, Lk = 2, 8, 8

    root = jax.random.PRNGKey(0)
    k_q, k_k, k_p = jax.random.split(root, 3)
    query = jax.random.normal(k_q, (B, Lq, hidden_dim), jnp.float32)
    key = jax.random.normal(k_k, (B, Lk, hidden_dim), jnp.float32)
    params = init_params(k_p, hidden_dim)

    out = multi_cross_att(query, key, params, num_heads)
    out = jax.block_until_ready(out)

    ref = reference_multi_cross_att(query, key, params, num_heads)
    assert out.shape == (B, Lq, hidden_dim)
    # Slightly looser tolerance than all-f32: the softmax denominator uses the
    # EUP approximate reciprocal (pl.reciprocal(approx=True)).
    assert jnp.allclose(out, ref, rtol=5e-3, atol=5e-3), "mismatch vs JAX reference"

    print("KERNEL_OK")
</pallas_src>

<mosaic_0001>
module attributes {stable_mosaic.version = 11 : i64} {
  func.func @kernel(%arg0: i32, %arg1: memref<2x8x32xf32, #tpu.memory_space<vmem>>, %arg2: memref<2x8x32xf32, #tpu.memory_space<vmem>>, %arg3: memref<32x32xf32, #tpu.memory_space<vmem>>, %arg4: memref<32x32xf32, #tpu.memory_space<vmem>>, %arg5: memref<32x32xf32, #tpu.memory_space<vmem>>, %arg6: memref<1x32xf32, #tpu.memory_space<vmem>>, %arg7: memref<1x32xf32, #tpu.memory_space<vmem>>, %arg8: memref<1x32xf32, #tpu.memory_space<vmem>>, %arg9: memref<32x32xf32, #tpu.memory_space<vmem>>, %arg10: memref<1x32xf32, #tpu.memory_space<vmem>>, %arg11: memref<2x8x32xf32, #tpu.memory_space<vmem>>) attributes {dimension_semantics = [#tpu.dimension_semantics<parallel>], iteration_bounds = array<i64: 1>, scalar_prefetch = 0 : i64, scratch_operands = 0 : i64, tpu.core_type = #tpu.core_type<tc>, window_params = [{transform_indices = @transform_0, window_bounds = array<i64: 2, 8, 32>}, {transform_indices = @transform_1, window_bounds = array<i64: 2, 8, 32>}, {pipeline_mode = #tpu.pipeline_mode<synchronous>, transform_indices = @transform_2, window_bounds = array<i64: 32, 32>}, {pipeline_mode = #tpu.pipeline_mode<synchronous>, transform_indices = @transform_3, window_bounds = array<i64: 32, 32>}, {pipeline_mode = #tpu.pipeline_mode<synchronous>, transform_indices = @transform_4, window_bounds = array<i64: 32, 32>}, {pipeline_mode = #tpu.pipeline_mode<synchronous>, transform_indices = @transform_5, window_bounds = array<i64: 1, 32>}, {pipeline_mode = #tpu.pipeline_mode<synchronous>, transform_indices = @transform_6, window_bounds = array<i64: 1, 32>}, {pipeline_mode = #tpu.pipeline_mode<synchronous>, transform_indices = @transform_7, window_bounds = array<i64: 1, 32>}, {pipeline_mode = #tpu.pipeline_mode<synchronous>, transform_indices = @transform_8, window_bounds = array<i64: 32, 32>}, {pipeline_mode = #tpu.pipeline_mode<synchronous>, transform_indices = @transform_9, window_bounds = array<i64: 1, 32>}, {transform_indices = @transform_10, window_bounds = array<i64: 2, 8, 32>}]} {
    %c0 = arith.constant 0 : index
    %c0_0 = arith.constant 0 : index
    %c0_1 = arith.constant 0 : index
    %0 = vector.load %arg1[%c0, %c0_0, %c0_1] : memref<2x8x32xf32, #tpu.memory_space<vmem>>, vector<2x8x32xf32>
    %1 = vector.shape_cast %0 : vector<2x8x32xf32> to vector<16x32xf32>
    %c0_2 = arith.constant 0 : index
    %c0_3 = arith.constant 0 : index
    %c0_4 = arith.constant 0 : index
    %2 = vector.load %arg2[%c0_2, %c0_3, %c0_4] : memref<2x8x32xf32, #tpu.memory_space<vmem>>, vector<2x8x32xf32>
    %3 = vector.shape_cast %2 : vector<2x8x32xf32> to vector<16x32xf32>
    %c0_5 = arith.constant 0 : index
    %c0_6 = arith.constant 0 : index
    %4 = vector.load %arg3[%c0_5, %c0_6] : memref<32x32xf32, #tpu.memory_space<vmem>>, vector<32x32xf32>
    %cst = arith.constant dense<0.000000e+00> : vector<16x32xf32>
    %5 = tpu.matmul %1, %4, %cst {dimension_numbers = #tpu.dot_dimension_numbers<[1], [0], [0], [1], [0, 0, 1, 1], [], []>} : vector<16x32xf32>, vector<32x32xf32>, vector<16x32xf32> -> vector<16x32xf32>
    %c0_7 = arith.constant 0 : index
    %c0_8 = arith.constant 0 : index
    %6 = vector.load %arg6[%c0_7, %c0_8] : memref<1x32xf32, #tpu.memory_space<vmem>>, vector<1x32xf32>
    %7 = vector.broadcast %6 : vector<1x32xf32> to vector<16x32xf32>
    %8 = arith.addf %5, %7 : vector<16x32xf32>
    %c0_9 = arith.constant 0 : index
    %c0_10 = arith.constant 0 : index
    %9 = vector.load %arg4[%c0_9, %c0_10] : memref<32x32xf32, #tpu.memory_space<vmem>>, vector<32x32xf32>
    %cst_11 = arith.constant dense<0.000000e+00> : vector<16x32xf32>
    %10 = tpu.matmul %3, %9, %cst_11 {dimension_numbers = #tpu.dot_dimension_numbers<[1], [0], [0], [1], [0, 0, 1, 1], [], []>} : vector<16x32xf32>, vector<32x32xf32>, vector<16x32xf32> -> vector<16x32xf32>
    %c0_12 = arith.constant 0 : index
    %c0_13 = arith.constant 0 : index
    %11 = vector.load %arg7[%c0_12, %c0_13] : memref<1x32xf32, #tpu.memory_space<vmem>>, vector<1x32xf32>
    %12 = vector.broadcast %11 : vector<1x32xf32> to vector<16x32xf32>
    %13 = arith.addf %10, %12 : vector<16x32xf32>
    %c0_14 = arith.constant 0 : index
    %c0_15 = arith.constant 0 : index
    %14 = vector.load %arg5[%c0_14, %c0_15] : memref<32x32xf32, #tpu.memory_space<vmem>>, vector<32x32xf32>
    %cst_16 = arith.constant dense<0.000000e+00> : vector<16x32xf32>
    %15 = tpu.matmul %3, %14, %cst_16 {dimension_numbers = #tpu.dot_dimension_numbers<[1], [0], [0], [1], [0, 0, 1, 1], [], []>} : vector<16x32xf32>, vector<32x32xf32>, vector<16x32xf32> -> vector<16x32xf32>
    %c0_17 = arith.constant 0 : index
    %c0_18 = arith.constant 0 : index
    %16 = vector.load %arg8[%c0_17, %c0_18] : memref<1x32xf32, #tpu.memory_space<vmem>>, vector<1x32xf32>
    %17 = vector.broadcast %16 : vector<1x32xf32> to vector<16x32xf32>
    %18 = arith.addf %15, %17 : vector<16x32xf32>
    %cst_19 = arith.constant 0.353553385 : f32
    %19 = vector.broadcast %cst_19 : f32 to vector<16x32xf32>
    %20 = arith.mulf %8, %19 : vector<16x32xf32>
    %21 = vector.shape_cast %20 : vector<16x32xf32> to vector<2x8x32xf32>
    %22 = vector.shape_cast %13 : vector<16x32xf32> to vector<2x8x32xf32>
    %23 = vector.shape_cast %18 : vector<16x32xf32> to vector<2x8x32xf32>
    %cst_20 = arith.constant 0.000000e+00 : f32
    %24 = vector.broadcast %cst_20 : f32 to vector<2x8x32xf32>
    %25 = vector.extract_strided_slice %21 {offsets = [0, 0, 0], sizes = [2, 8, 8], strides = [1, 1, 1]} : vector<2x8x32xf32> to vector<2x8x8xf32>
    %26 = vector.extract_strided_slice %22 {offsets = [0, 0, 0], sizes = [2, 8, 8], strides = [1, 1, 1]} : vector<2x8x32xf32> to vector<2x8x8xf32>
    %27 = vector.extract_strided_slice %23 {offsets = [0, 0, 0], sizes = [2, 8, 8], strides = [1, 1, 1]} : vector<2x8x32xf32> to vector<2x8x8xf32>
    %cst_21 = arith.constant dense<0.000000e+00> : vector<2x8x8xf32>
    %28 = tpu.matmul %25, %26, %cst_21 {dimension_numbers = #tpu.dot_dimension_numbers<[2], [2], [1], [1], [0, 0, 0, 1, 1, 1], [0], [0]>} : vector<2x8x8xf32>, vector<2x8x8xf32>, vector<2x8x8xf32> -> vector<2x8x8xf32>
    %cst_22 = arith.constant dense<0xFF800000> : vector<2x8xf32>
    %29 = vector.multi_reduction <maximumf>, %28, %cst_22 [2] : vector<2x8x8xf32> to vector<2x8xf32>
    %30 = vector.shape_cast %29 : vector<2x8xf32> to vector<2x8x1xf32>
    %31 = vector.broadcast %30 : vector<2x8x1xf32> to vector<2x8x8xf32>
    %32 = arith.subf %28, %31 : vector<2x8x8xf32>
    %33 = math.exp %32 : vector<2x8x8xf32>
    %cst_23 = arith.constant dense<0.000000e+00> : vector<2x8x8xf32>
    %34 = tpu.matmul %33, %27, %cst_23 {dimension_numbers = #tpu.dot_dimension_numbers<[2], [1], [1], [2], [0, 0, 0, 1, 1, 2], [0], [0]>} : vector<2x8x8xf32>, vector<2x8x8xf32>, vector<2x8x8xf32> -> vector<2x8x8xf32>
    %cst_24 = arith.constant dense<0.000000e+00> : vector<2x8xf32>
    %35 = vector.multi_reduction <add>, %33, %cst_24 [2] : vector<2x8x8xf32> to vector<2x8xf32>
    %36 = vector.shape_cast %35 : vector<2x8xf32> to vector<2x8x1xf32>
    %37 = tpu.reciprocal %36 {approx = true} : vector<2x8x1xf32> -> vector<2x8x1xf32>
    %38 = vector.broadcast %37 : vector<2x8x1xf32> to vector<2x8x8xf32>
    %39 = arith.mulf %34, %38 : vector<2x8x8xf32>
    %c0_25 = arith.constant 0 : index
    %c0_26 = arith.constant 0 : index
    %40 = vector.load %arg9[%c0_25, %c0_26] : memref<32x32xf32, #tpu.memory_space<vmem>>, vector<8x32xf32>
    %cst_27 = arith.constant dense<0.000000e+00> : vector<2x8x32xf32>
    %41 = tpu.matmul %39, %40, %cst_27 {dimension_numbers = #tpu.dot_dimension_numbers<[2], [0], [0, 1], [1], [0, 0, 0, 1, 1, 1], [], []>} : vector<2x8x8xf32>, vector<8x32xf32>, vector<2x8x32xf32> -> vector<2x8x32xf32>
    %42 = arith.addf %24, %41 : vector<2x8x32xf32>
    %43 = vector.extract_strided_slice %21 {offsets = [0, 0, 8], sizes = [2, 8, 8], strides = [1, 1, 1]} : vector<2x8x32xf32> to vector<2x8x8xf32>
    %44 = vector.extract_strided_slice %22 {offsets = [0, 0, 8], sizes = [2, 8, 8], strides = [1, 1, 1]} : vector<2x8x32xf32> to vector<2x8x8xf32>
    %45 = vector.extract_strided_slice %23 {offsets = [0, 0, 8], sizes = [2, 8, 8], strides = [1, 1, 1]} : vector<2x8x32xf32> to vector<2x8x8xf32>
    %cst_28 = arith.constant dense<0.000000e+00> : vector<2x8x8xf32>
    %46 = tpu.matmul %43, %44, %cst_28 {dimension_numbers = #tpu.dot_dimension_numbers<[2], [2], [1], [1], [0, 0, 0, 1, 1, 1], [0], [0]>} : vector<2x8x8xf32>, vector<2x8x8xf32>, vector<2x8x8xf32> -> vector<2x8x8xf32>
    %cst_29 = arith.constant dense<0xFF800000> : vector<2x8xf32>
    %47 = vector.multi_reduction <maximumf>, %46, %cst_29 [2] : vector<2x8x8xf32> to vector<2x8xf32>
    %48 = vector.shape_cast %47 : vector<2x8xf32> to vector<2x8x1xf32>
    %49 = vector.broadcast %48 : vector<2x8x1xf32> to vector<2x8x8xf32>
    %50 = arith.subf %46, %49 : vector<2x8x8xf32>
    %51 = math.exp %50 : vector<2x8x8xf32>
    %cst_30 = arith.constant dense<0.000000e+00> : vector<2x8x8xf32>
    %52 = tpu.matmul %51, %45, %cst_30 {dimension_numbers = #tpu.dot_dimension_numbers<[2], [1], [1], [2], [0, 0, 0, 1, 1, 2], [0], [0]>} : vector<2x8x8xf32>, vector<2x8x8xf32>, vector<2x8x8xf32> -> vector<2x8x8xf32>
    %cst_31 = arith.constant dense<0.000000e+00> : vector<2x8xf32>
    %53 = vector.multi_reduction <add>, %51, %cst_31 [2] : vector<2x8x8xf32> to vector<2x8xf32>
    %54 = vector.shape_cast %53 : vector<2x8xf32> to vector<2x8x1xf32>
    %55 = tpu.reciprocal %54 {approx = true} : vector<2x8x1xf32> -> vector<2x8x1xf32>
    %56 = vector.broadcast %55 : vector<2x8x1xf32> to vector<2x8x8xf32>
    %57 = arith.mulf %52, %56 : vector<2x8x8xf32>
    %c8 = arith.constant 8 : index
    %c0_32 = arith.constant 0 : index
    %58 = vector.load %arg9[%c8, %c0_32] : memref<32x32xf32, #tpu.memory_space<vmem>>, vector<8x32xf32>
    %cst_33 = arith.constant dense<0.000000e+00> : vector<2x8x32xf32>
    %59 = tpu.matmul %57, %58, %cst_33 {dimension_numbers = #tpu.dot_dimension_numbers<[2], [0], [0, 1], [1], [0, 0, 0, 1, 1, 1], [], []>} : vector<2x8x8xf32>, vector<8x32xf32>, vector<2x8x32xf32> -> vector<2x8x32xf32>
    %60 = arith.addf %42, %59 : vector<2x8x32xf32>
    %61 = vector.extract_strided_slice %21 {offsets = [0, 0, 16], sizes = [2, 8, 8], strides = [1, 1, 1]} : vector<2x8x32xf32> to vector<2x8x8xf32>
    %62 = vector.extract_strided_slice %22 {offsets = [0, 0, 16], sizes = [2, 8, 8], strides = [1, 1, 1]} : vector<2x8x32xf32> to vector<2x8x8xf32>
    %63 = vector.extract_strided_slice %23 {offsets = [0, 0, 16], sizes = [2, 8, 8], strides = [1, 1, 1]} : vector<2x8x32xf32> to vector<2x8x8xf32>
    %cst_34 = arith.constant dense<0.000000e+00> : vector<2x8x8xf32>
    %64 = tpu.matmul %61, %62, %cst_34 {dimension_numbers = #tpu.dot_dimension_numbers<[2], [2], [1], [1], [0, 0, 0, 1, 1, 1], [0], [0]>} : vector<2x8x8xf32>, vector<2x8x8xf32>, vector<2x8x8xf32> -> vector<2x8x8xf32>
    %cst_35 = arith.constant dense<0xFF800000> : vector<2x8xf32>
    %65 = vector.multi_reduction <maximumf>, %64, %cst_35 [2] : vector<2x8x8xf32> to vector<2x8xf32>
    %66 = vector.shape_cast %65 : vector<2x8xf32> to vector<2x8x1xf32>
    %67 = vector.broadcast %66 : vector<2x8x1xf32> to vector<2x8x8xf32>
    %68 = arith.subf %64, %67 : vector<2x8x8xf32>
    %69 = math.exp %68 : vector<2x8x8xf32>
    %cst_36 = arith.constant dense<0.000000e+00> : vector<2x8x8xf32>
    %70 = tpu.matmul %69, %63, %cst_36 {dimension_numbers = #tpu.dot_dimension_numbers<[2], [1], [1], [2], [0, 0, 0, 1, 1, 2], [0], [0]>} : vector<2x8x8xf32>, vector<2x8x8xf32>, vector<2x8x8xf32> -> vector<2x8x8xf32>
    %cst_37 = arith.constant dense<0.000000e+00> : vector<2x8xf32>
    %71 = vector.multi_reduction <add>, %69, %cst_37 [2] : vector<2x8x8xf32> to vector<2x8xf32>
    %72 = vector.shape_cast %71 : vector<2x8xf32> to vector<2x8x1xf32>
    %73 = tpu.reciprocal %72 {approx = true} : vector<2x8x1xf32> -> vector<2x8x1xf32>
    %74 = vector.broadcast %73 : vector<2x8x1xf32> to vector<2x8x8xf32>
    %75 = arith.mulf %70, %74 : vector<2x8x8xf32>
    %c16 = arith.constant 16 : index
    %c0_38 = arith.constant 0 : index
    %76 = vector.load %arg9[%c16, %c0_38] : memref<32x32xf32, #tpu.memory_space<vmem>>, vector<8x32xf32>
    %cst_39 = arith.constant dense<0.000000e+00> : vector<2x8x32xf32>
    %77 = tpu.matmul %75, %76, %cst_39 {dimension_numbers = #tpu.dot_dimension_numbers<[2], [0], [0, 1], [1], [0, 0, 0, 1, 1, 1], [], []>} : vector<2x8x8xf32>, vector<8x32xf32>, vector<2x8x32xf32> -> vector<2x8x32xf32>
    %78 = arith.addf %60, %77 : vector<2x8x32xf32>
    %79 = vector.extract_strided_slice %21 {offsets = [0, 0, 24], sizes = [2, 8, 8], strides = [1, 1, 1]} : vector<2x8x32xf32> to vector<2x8x8xf32>
    %80 = vector.extract_strided_slice %22 {offsets = [0, 0, 24], sizes = [2, 8, 8], strides = [1, 1, 1]} : vector<2x8x32xf32> to vector<2x8x8xf32>
    %81 = vector.extract_strided_slice %23 {offsets = [0, 0, 24], sizes = [2, 8, 8], strides = [1, 1, 1]} : vector<2x8x32xf32> to vector<2x8x8xf32>
    %cst_40 = arith.constant dense<0.000000e+00> : vector<2x8x8xf32>
    %82 = tpu.matmul %79, %80, %cst_40 {dimension_numbers = #tpu.dot_dimension_numbers<[2], [2], [1], [1], [0, 0, 0, 1, 1, 1], [0], [0]>} : vector<2x8x8xf32>, vector<2x8x8xf32>, vector<2x8x8xf32> -> vector<2x8x8xf32>
    %cst_41 = arith.constant dense<0xFF800000> : vector<2x8xf32>
    %83 = vector.multi_reduction <maximumf>, %82, %cst_41 [2] : vector<2x8x8xf32> to vector<2x8xf32>
    %84 = vector.shape_cast %83 : vector<2x8xf32> to vector<2x8x1xf32>
    %85 = vector.broadcast %84 : vector<2x8x1xf32> to vector<2x8x8xf32>
    %86 = arith.subf %82, %85 : vector<2x8x8xf32>
    %87 = math.exp %86 : vector<2x8x8xf32>
    %cst_42 = arith.constant dense<0.000000e+00> : vector<2x8x8xf32>
    %88 = tpu.matmul %87, %81, %cst_42 {dimension_numbers = #tpu.dot_dimension_numbers<[2], [1], [1], [2], [0, 0, 0, 1, 1, 2], [0], [0]>} : vector<2x8x8xf32>, vector<2x8x8xf32>, vector<2x8x8xf32> -> vector<2x8x8xf32>
    %cst_43 = arith.constant dense<0.000000e+00> : vector<2x8xf32>
    %89 = vector.multi_reduction <add>, %87, %cst_43 [2] : vector<2x8x8xf32> to vector<2x8xf32>
    %90 = vector.shape_cast %89 : vector<2x8xf32> to vector<2x8x1xf32>
    %91 = tpu.reciprocal %90 {approx = true} : vector<2x8x1xf32> -> vector<2x8x1xf32>
    %92 = vector.broadcast %91 : vector<2x8x1xf32> to vector<2x8x8xf32>
    %93 = arith.mulf %88, %92 : vector<2x8x8xf32>
    %c24 = arith.constant 24 : index
    %c0_44 = arith.constant 0 : index
    %94 = vector.load %arg9[%c24, %c0_44] : memref<32x32xf32, #tpu.memory_space<vmem>>, vector<8x32xf32>
    %cst_45 = arith.constant dense<0.000000e+00> : vector<2x8x32xf32>
    %95 = tpu.matmul %93, %94, %cst_45 {dimension_numbers = #tpu.dot_dimension_numbers<[2], [0], [0, 1], [1], [0, 0, 0, 1, 1, 1], [], []>} : vector<2x8x8xf32>, vector<8x32xf32>, vector<2x8x32xf32> -> vector<2x8x32xf32>
    %96 = arith.addf %78, %95 : vector<2x8x32xf32>
    %c0_46 = arith.constant 0 : index
    %c0_47 = arith.constant 0 : index
    %97 = vector.load %arg10[%c0_46, %c0_47] : memref<1x32xf32, #tpu.memory_space<vmem>>, vector<1x32xf32>
    %98 = vector.shape_cast %97 : vector<1x32xf32> to vector<1x1x32xf32>
    %99 = vector.broadcast %98 : vector<1x1x32xf32> to vector<2x8x32xf32>
    %100 = arith.addf %96, %99 : vector<2x8x32xf32>
    %c0_48 = arith.constant 0 : index
    %c0_49 = arith.constant 0 : index
    %c0_50 = arith.constant 0 : index
    %101 = vector.load %arg11[%c0_48, %c0_49, %c0_50] : memref<2x8x32xf32, #tpu.memory_space<vmem>>, vector<2x8x32xf32>
    tpu.vector_store %arg11[%c0_48, %c0_49, %c0_50], %100 {strides = array<i32>} : memref<2x8x32xf32, #tpu.memory_space<vmem>>, vector<2x8x32xf32>,
    return
  }
  func.func @transform_0(%arg0: i32) -> (i32, i32, i32) {
    %c0_i32 = arith.constant 0 : i32
    %c0_i32_0 = arith.constant 0 : i32
    %c0_i32_1 = arith.constant 0 : i32
    return %arg0, %c0_i32, %c0_i32_0 : i32, i32, i32
  }
  func.func @transform_1(%arg0: i32) -> (i32, i32, i32) {
    %c0_i32 = arith.constant 0 : i32
    %c0_i32_0 = arith.constant 0 : i32
    %c0_i32_1 = arith.constant 0 : i32
    return %arg0, %c0_i32, %c0_i32_0 : i32, i32, i32
  }
  func.func @transform_2(%arg0: i32) -> (i32, i32) {
    %c0_i32 = arith.constant 0 : i32
    %c0_i32_0 = arith.constant 0 : i32
    %c0_i32_1 = arith.constant 0 : i32
    return %c0_i32, %c0_i32_0 : i32, i32
  }
  func.func @transform_3(%arg0: i32) -> (i32, i32) {
    %c0_i32 = arith.constant 0 : i32
    %c0_i32_0 = arith.constant 0 : i32
    %c0_i32_1 = arith.constant 0 : i32
    return %c0_i32, %c0_i32_0 : i32, i32
  }
  func.func @transform_4(%arg0: i32) -> (i32, i32) {
    %c0_i32 = arith.constant 0 : i32
    %c0_i32_0 = arith.constant 0 : i32
    %c0_i32_1 = arith.constant 0 : i32
    return %c0_i32, %c0_i32_0 : i32, i32
  }
  func.func @transform_5(%arg0: i32) -> (i32, i32) {
    %c0_i32 = arith.constant 0 : i32
    %c0_i32_0 = arith.constant 0 : i32
    %c0_i32_1 = arith.constant 0 : i32
    return %c0_i32, %c0_i32_0 : i32, i32
  }
  func.func @transform_6(%arg0: i32) -> (i32, i32) {
    %c0_i32 = arith.constant 0 : i32
    %c0_i32_0 = arith.constant 0 : i32
    %c0_i32_1 = arith.constant 0 : i32
    return %c0_i32, %c0_i32_0 : i32, i32
  }
  func.func @transform_7(%arg0: i32) -> (i32, i32) {
    %c0_i32 = arith.constant 0 : i32
    %c0_i32_0 = arith.constant 0 : i32
    %c0_i32_1 = arith.constant 0 : i32
    return %c0_i32, %c0_i32_0 : i32, i32
  }
  func.func @transform_8(%arg0: i32) -> (i32, i32) {
    %c0_i32 = arith.constant 0 : i32
    %c0_i32_0 = arith.constant 0 : i32
    %c0_i32_1 = arith.constant 0 : i32
    return %c0_i32, %c0_i32_0 : i32, i32
  }
  func.func @transform_9(%arg0: i32) -> (i32, i32) {
    %c0_i32 = arith.constant 0 : i32
    %c0_i32_0 = arith.constant 0 : i32
    %c0_i32_1 = arith.constant 0 : i32
    return %c0_i32, %c0_i32_0 : i32, i32
  }
  func.func @transform_10(%arg0: i32) -> (i32, i32, i32) {
    %c0_i32 = arith.constant 0 : i32
    %c0_i32_0 = arith.constant 0 : i32
    %c0_i32_1 = arith.constant 0 : i32
    return %arg0, %c0_i32, %c0_i32_0 : i32, i32, i32
  }
}

</mosaic_0001>

<bundles_post_ra>
// kernel: tpu_custom_call.1
= control target key start
LH: loop header
LB: loop body
LE: loop exit
PB: predicated region body
PF: predicated region fallthrough
CT: control target
= control target key end

     0   :  { %15 = vsyncpa [#allocation3], 0  ;;  %s1424_s0 = inlined_call_operand.hbm [shape: f32[2,8,32], index: 0, kind: input, shape index: {}]   ;;  %s1425_s1 = inlined_call_operand.hbm [shape: f32[2,8,32], index: 1, kind: input, shape index: {}]   ;;  %s1426_s2 = inlined_call_operand.hbm [shape: f32[32,32], index: 2, kind: input, shape index: {}]   ;;  %s1427_s3 = inlined_call_operand.hbm [shape: f32[32,32], index: 3, kind: input, shape index: {}]   ;;  %s1428_s4 = inlined_call_operand.hbm [shape: f32[32,32], index: 4, kind: input, shape index: {}]   ;;  %s1429_s5 = inlined_call_operand.vmem [shape: f32[1,32], index: 5, kind: input, shape index: {}]   ;;  %s1430_s6 = inlined_call_operand.vmem [shape: f32[1,32], index: 6, kind: input, shape index: {}]   ;;  %s1431_s7 = inlined_call_operand.vmem [shape: f32[1,32], index: 7, kind: input, shape index: {}]   ;;  %s1432_s8 = inlined_call_operand.hbm [shape: f32[32,32], index: 8, kind: input, shape index: {}]   ;;  %s1433_s9 = inlined_call_operand.vmem [shape: f32[1,32], index: 9, kind: input, shape index: {}]   ;;  %s1434_s10 = inlined_call_operand.hbm [shape: f32[2,8,32], index: 10, kind: output, shape index: {}]  }
   0x1   :  { %16 = vsyncpa [#allocation6], 0 }
   0x2   :  { %17 = vsyncpa [#allocation9], 0 }
   0x3   :  { %18 = vsyncpa [#allocation12], 0 }
   0x4   :  { %19 = vsyncpa [#allocation4], 0  ;;  %s37_s15 = sshll.u32 %s1425_s1, 4  ;;  %s1178_s16 = smov [#allocation5]   ;;  %s38_s15 = int_to_ptr.hbm [resolvable:$true] %s37_s15 }
   0x5   :  { %s39_s17 = sshll.u32 %s1178_s16, 4  ;;  %s63_s20 = sshll.u32 %s1427_s3, 4  ;;  %s40_s17 = int_to_ptr.vmem [resolvable:$true] %s39_s17  ;;  %s64_s20 = int_to_ptr.hbm [resolvable:$true] %s63_s20 }
   0x6   :  { %s1179_s21 = smov 128   ;;  %s1180_s22 = smov 8  }
   0x7   :  { %45 = dma.hbm_to_vmem [thread:$0]  %s38_s15, 256, %s40_s17, [#allocation6], %s1179_s21, %s1179_s21, %s1180_s22  }
   0x8   :  { %s1181_s23 = smov [#allocation8]   ;;  %s24_s1 = sshll.u32 %s1424_s0, 4  ;;  %s25_s1 = int_to_ptr.hbm [resolvable:$true] %s24_s1 }
   0x9   :  { %s65_s24 = sshll.u32 %s1181_s23, 4  ;;  %s50_s28 = sshll.u32 %s1426_s2, 4  ;;  %s66_s24 = int_to_ptr.vmem [resolvable:$true] %s65_s24  ;;  %s51_s28 = int_to_ptr.hbm [resolvable:$true] %s50_s28 }
   0xa   :  { %71 = dma.hbm_to_vmem [thread:$0]  %s64_s20, 512, %s66_s24, [#allocation9], %s1179_s21, %s1179_s21, %s1180_s22  }
   0xb   :  { %s1182_s29 = smov [#allocation2]   ;;  %s1183_s11 = smov [#allocation7]  }
   0xc   :  { %s26_s30 = sshll.u32 %s1182_s29, 4  ;;  %s52_s0 = sshll.u32 %s1183_s11, 4  ;;  %s27_s30 = int_to_ptr.vmem [resolvable:$true] %s26_s30  ;;  %s53_s0 = int_to_ptr.vmem [resolvable:$true] %s52_s0 }
   0xd   :  { %32 = dma.hbm_to_vmem [thread:$0]  %s25_s1, 256, %s27_s30, [#allocation3], %s1179_s21, %s1179_s21, %s1180_s22  }
   0xe   :  { %s76_s14 = sshll.u32 %s1428_s4, 4  ;;  %s95_s16 = sshll.u32 %s1432_s8, 4  ;;  %s77_s14 = int_to_ptr.hbm [resolvable:$true] %s76_s14  ;;  %s96_s16 = int_to_ptr.hbm [resolvable:$true] %s95_s16 }
   0xf   :  { %58 = dma.hbm_to_vmem [thread:$0]  %s51_s28, 512, %s53_s0, [#allocation6], %s1179_s21, %s1179_s21, %s1180_s22  }
  0x10   :  { %s1184_s17 = smov [#allocation10]   ;;  %s1185_s19 = smov [#allocation11]  }
  0x11   :  { %s78_s18 = sshll.u32 %s1184_s17, 4  ;;  %s97_s4 = sshll.u32 %s1185_s19, 4  ;;  %s79_s18 = int_to_ptr.vmem [resolvable:$true] %s78_s18  ;;  %s98_s4 = int_to_ptr.vmem [resolvable:$true] %s97_s4 }
  0x12   :  { %84 = dma.hbm_to_vmem [thread:$0]  %s77_s14, 512, %s79_s18, [#allocation9], %s1179_s21, %s1179_s21, %s1180_s22  }
  0x13   :  { %103 = dma.hbm_to_vmem [thread:$0]  %s96_s16, 512, %s98_s4, [#allocation12], %s1179_s21, %s1179_s21, %s1180_s22  }
  0x14   :  { %1168 = dma.done.wait [#allocation3], 256  }
  0x15   :  { %1169 = vsyncadd [#allocation3], 4294967040 }
  0x16   :  { %1170 = dma.done.wait [#allocation6], 768  }
  0x17   :  { %1171 = vsyncadd [#allocation6], 4294966528 }
  0x18   :  { %1172 = dma.done.wait [#allocation9], 1024  }
  0x19   :  { %1173 = vsyncadd [#allocation9], 4294966272 }
  0x1a   :  { %1174 = dma.done.wait [#allocation12], 512  }
  0x1b   :  { %1175 = vsyncadd [#allocation12], 4294966784  ;;  %v175_v0 = vld [vmem:[#allocation8 + $0x18] sm:$0xff]  ;;  %v174_v3 = vld [vmem:[#allocation8 + $0x10] sm:$0xff]  ;;  %vm142_vm0 = vcmask 261120   ;;  %vm242_vm1 = vcmask 64512  }
  0x1c   :  { %v212_v1 = vld [vmem:[#allocation10 + $0x18] sm:$0xff]  ;;  %198 = vmatpush.msra.mxu1 %v175_v0  ;;  %v211_v4 = vld [vmem:[#allocation10 + $0x10] sm:$0xff]  ;;  %v173_v6 = vld [vmem:[#allocation8 + $0x8] sm:$0xff]  ;;  %s1186_s25 = smov 120   ;;  %s1189_s27 = smov [#allocation13]  }
  0x1d   :  { %v137_v2 = vld [vmem:[#allocation7 + $0x18] sm:$0xff]  ;;  %229 = vmatpush.msra.mxu2 %v212_v1  ;;  %v136_v5 = vld [vmem:[#allocation7 + $0x10] sm:$0xff]  ;;  %v210_v7 = vld [vmem:[#allocation10 + $0x8] sm:$0xff]  ;;  %s891_s28 = sshll.u32 %s1189_s27, 4  ;;  %s893_s11 = sshll.u32 %s1434_s10, 4  ;;  %s892_s28 = int_to_ptr.vmem [resolvable:$true] %s891_s28  ;;  %s894_s11 = int_to_ptr.hbm [resolvable:$true] %s893_s11 }
  0x1e   :  { %161 = vmatpush.msra.mxu0 %v137_v2  ;;  %199 = vmatpush.msra.mxu1 %v174_v3  ;;  %v135_v8 = vld [vmem:[#allocation7 + $0x8] sm:$0xff]  ;;  %v172_v9 = vld [vmem:[#allocation8] sm:$0xff]  ;;  %v132_v12 = vld [vmem:[#allocation5] sm:$0xff] }
  0x1f   :  { %230 = vmatpush.msra.mxu2 %v211_v4  ;;  %v209_v10 = vld [vmem:[#allocation10] sm:$0xff]  ;;  %v133_v14 = vld [vmem:[#allocation5 + $0x8] sm:$0xff]  ;;  %v131_v15 = vld [vmem:[#allocation2 + $0x8] sm:$0xff] }
  0x20   :  { %162 = vmatpush.msra.mxu0 %v136_v5  ;;  %v134_v11 = vld [vmem:[#allocation7] sm:$0xff]  ;;  %200 = vmatpush.msra.mxu1 %v173_v6 }
  0x21   :  { %231 = vmatpush.msra.mxu2 %v210_v7  ;;  %v130_v13 = vld [vmem:[#allocation2] sm:$0xff] }
  0x22   :  { %163 = vmatpush.msra.mxu0 %v135_v8  ;;  %201 = vmatpush.msra.mxu1 %v172_v9  ;;  %v964_v16 = vld [vmem:[%s1430_s6] ss:$0 sm:$0xff] }
  0x23   :  { %232 = vmatpush.msra.mxu2 %v209_v10  ;;  %911 = vmatmul.msk.f32.vlgmr.msra.gmra.mxu1 %vm142_vm0, %v132_v12  ;;  %v965_v17 = vld [vmem:[%s1429_s5] ss:$0 sm:$0xff]  ;;  %s1187_s5 = smov 112  }
  0x24   :  { %164 = vmatpush.msra.mxu0 %v134_v11  ;;  %913 = vmatmul.msk.f32.vlgmr.msra.gmra.mxu2 %vm142_vm0, %v132_v12  ;;  %v966_v23 = vld [vmem:[%s1431_s7] ss:$0 sm:$0xff]  ;;  %s1188_s7 = smov 104  }
  0x25   :  { %909 = vmatmul.msk.f32.vlgmr.msra.gmra.mxu0 %vm142_vm0, %v130_v13  ;;  %v363_v47 = vld [vmem:[#allocation11] sm:$0xff] }
  0x2b   :  { %912 = vmatmul.msk.f32.gmra.mxu1 %vm142_vm0, %v133_v14 }
  0x2c   :  { %914 = vmatmul.msk.f32.gmra.mxu2 %vm142_vm0, %v133_v14 }
  0x2d   :  { %910 = vmatmul.msk.f32.gmra.mxu0 %vm142_vm0, %v131_v15 }
  0xa0   :  { %v203_v18 = vpop.f32.mrf.mxu1 }
  0xa1   :  { %v1293_v19 = vadd.f32 %v964_v16, %v203_v18 }
  0xa2   :  { %v166_v20 = vpop.f32.mrf.mxu0 }
  0xa3   :  { %v167_v21 = vadd.f32 %v965_v17, %v166_v20  ;;  %366 = vrot.lane.b32.xlu0 %v1293_v19, %s1186_s25  ;;  %915 = vmatpush.xpose.msk.msrb.mxu0 %vm242_vm1, %v1293_v19 }
  0xa5   :  { %v1299_v22 = vmul.f32 0.35355338, %v167_v21 }
  0xa7   :  { %916 = vmatmul.msk.f32.vlgmr.msrb.gmra.mxu0 %vm242_vm1, %v1299_v22  ;;  %v234_v24 = vpop.f32.mrf.mxu2 }
  0xa8   :  { %v1306_v25 = vadd.f32 %v966_v23, %v234_v24  ;;  %v206_v26 = vpop.f32.mrf.mxu1 }
  0xa9   :  { %v1308_v27 = vadd.f32 %v964_v16, %v206_v26 }
  0xaa   :  { %v169_v28 = vpop.f32.mrf.mxu0  ;;  %433 = vrot.lane.b32.xlu2 %v1306_v25, %s1186_s25 }
  0xab   :  { %v170_v29 = vadd.f32 %v965_v17, %v169_v28  ;;  %917 = vmatpush.xpose.msk.msra.mxu3 %vm242_vm1, %v1308_v27  ;;  %364 = vrot.lane.b32.xlu0 %v1299_v22, %s1186_s25 }
  0xad   :  { %v1316_v30 = vmul.f32 0.35355338, %v170_v29 }
  0xaf   :  { %325 = vmatpush.msrb.mxu3 %v1306_v25  ;;  %v237_v38 = vpop.f32.mrf.mxu2 }
  0xb0   :  { %918 = vmatmul.msk.f32.vlgmr.msra.gmra.mxu3 %vm242_vm1, %v1316_v30  ;;  %v1332_v39 = vadd.f32 %v966_v23, %v237_v38 }
  0xb2   :  { %394 = vrot.lane.b32.xlu2 %v1308_v27, %s1186_s25  ;;  %348 = vmatpush.msra.mxu0 %v1332_v39  ;;  %v959_v24 = vpack.i.bf16 %v1332_v39, %v1306_v25 }
  0xb3   :  { %392 = vrot.lane.b32.xlu0 %v1316_v30, %s1186_s25 }
  0xba   :  { %555 = vrot.lane.b32.xlu2 %v1299_v22, %s1187_s5 }
  0xc2   :  { %460 = vrot.lane.b32.xlu2 %v1332_v39, %s1186_s25 }
  0xca   :  { %583 = vrot.lane.b32.xlu2 %v1316_v30, %s1187_s5 }
 0x104   :  { %v434_v31 = vpop.permute.xlu2 %433 }
 0x105   :  { %454 = vmatpush.msra.mxu3 %v434_v31 }
 0x10c   :  { %v395_v32 = vpop.permute.xlu2 %394 }
 0x10d   :  { %923 = vmatpush.xpose.msk.msrb.mxu2 %vm242_vm1, %v395_v32 }
 0x111   :  { %547 = vmatpush.msra.mxu2 %v363_v47 }
 0x114   :  { %v556_v49 = vpop.permute.xlu2 %555 }
 0x115   :  { %v367_v33 = vpop.permute.xlu0 %366 }
 0x116   :  { %921 = vmatpush.xpose.msk.msrb.mxu1 %vm242_vm1, %v367_v33 }
 0x11c   :  { %v461_v54 = vpop.permute.xlu2 %460 }
 0x11d   :  { %v365_v34 = vpop.permute.xlu0 %364  ;;  %481 = vmatpush.msrb.mxu0 %v461_v54 }
 0x11e   :  { %922 = vmatmul.msk.f32.vlgmr.msrb.gmra.mxu1 %vm242_vm1, %v365_v34 }
 0x124   :  { %v266_v35 = vpop.f32.mrf.mxu0  ;;  %v584_v0 = vpop.permute.xlu2 %583 }
 0x125   :  { %v295_v36 = vsel %vm242_vm1, %v266_v35, -inf  ;;  %v393_v37 = vpop.permute.xlu0 %392 }
 0x126   :  { %296 = vmax.xlane.f32.xlu1 %v295_v36  ;;  %924 = vmatmul.msk.f32.vlgmr.msrb.gmra.mxu2 %vm242_vm1, %v393_v37 }
 0x133   :  { %v292_v40 = vpop.f32.mrf.mxu3 }
 0x134   :  { %v298_v41 = vsel %vm242_vm1, %v292_v40, -inf }
 0x135   :  { %299 = vmax.xlane.f32.xlu0 %v298_v41 }
 0x149   :  { %623 = vrot.lane.b32.xlu0 %v1306_v25, %s1187_s5 }
 0x151   :  { %719 = vrot.lane.b32.xlu0 %v1293_v19, %s1188_s7 }
 0x199   :  { %v297_v42 = vpop.xlane.xlu1 %296 }
 0x19a   :  { %v301_v43 = vsub.f32 %v266_v35, %v297_v42 }
 0x19b   :  { %v389_v45 = vpop.f32.mrf.mxu1 }
 0x19c   :  { %v303_v44 = vmul.f32 1.442695, %v301_v43  ;;  %v420_v46 = vsel %vm242_vm1, %v389_v45, -inf }
 0x19d   :  { %421 = vmax.xlane.f32.xlu1 %v420_v46 }
 0x19e   :  { %968 = vpow2.f32 %v303_v44 }
 0x1a4   :  { %v969_v48 = vpop.eup %968 }
 0x1a5   :  { %919 = vmatmul.msk.f32.vlgmr.msrb.gmra.mxu3 %vm242_vm1, %v969_v48  ;;  %v353_v50 = vsel %vm242_vm1, %v969_v48, 0.0 }
 0x1a6   :  { %354 = vadd.xlane.f32.xlu2 %v353_v50 }
 0x1a8   :  { %v300_v51 = vpop.xlane.xlu0 %299 }
 0x1a9   :  { %v302_v52 = vsub.f32 %v292_v40, %v300_v51  ;;  %v417_v59 = vpop.f32.mrf.mxu2 }
 0x1aa   :  { %v423_v60 = vsel %vm242_vm1, %v417_v59, -inf }
 0x1ab   :  { %v305_v53 = vmul.f32 1.442695, %v302_v52 }
 0x1ad   :  { %970 = vpow2.f32 %v305_v53  ;;  %v847_v53 = vld [vmem:[#allocation11 + $0x18] sm:$0xff] }
 0x1b3   :  { %v971_v55 = vpop.eup %970 }
 0x1b4   :  { %920 = vmatmul.msk.f32.vlgmr.msra.gmra.mxu0 %vm242_vm1, %v971_v55  ;;  %v356_v56 = vsel %vm242_vm1, %v971_v55, 0.0 }
 0x1b5   :  { %357 = vadd.xlane.f32.xlu2 %v356_v56 }
 0x1b6   :  { %557 = vrot.lane.b32.xlu1 %v1293_v19, %s1187_s5 }
 0x1bb   :  { %v624_v57 = vpop.permute.xlu0 %623 }
 0x1be   :  { %585 = vrot.lane.b32.xlu1 %v1308_v27, %s1187_s5 }
 0x1c3   :  { %v720_v58 = vpop.permute.xlu0 %719 }
 0x1c4   :  { %939 = vmatpush.xpose.msk.msrb.mxu2 %vm242_vm1, %v720_v58 }
 0x1cd   :  { %717 = vrot.lane.b32.xlu2 %v1299_v22, %s1188_s7 }
 0x1e8   :  { %424 = vmax.xlane.f32.xlu1 %v423_v60  ;;  %v496_v60 = vld [vmem:[#allocation11 + $0x8] sm:$0xff] }
 0x1e9   :  { %518 = vmatpush.msra.mxu1 %v496_v60 }
 0x201   :  { %745 = vrot.lane.b32.xlu1 %v1316_v30, %s1188_s7 }
 0x210   :  { %v422_v61 = vpop.xlane.xlu1 %421 }
 0x211   :  { %v426_v62 = vsub.f32 %v389_v45, %v422_v61 }
 0x213   :  { %v428_v63 = vmul.f32 1.442695, %v426_v62 }
 0x215   :  { %972 = vpow2.f32 %v428_v63  ;;  %v685_v63 = vld [vmem:[#allocation11 + $0x10] sm:$0xff] }
 0x216   :  { %707 = vmatpush.msrb.mxu1 %v685_v63 }
 0x219   :  { %v355_v2 = vpop.xlane.xlu2 %354 }
 0x21a   :  { %974 = vrcp.f32 %v355_v2 }
 0x21b   :  { %v1359_v1 = vpop.eup %972 }
 0x21c   :  { %925 = vmatmul.msk.f32.vlgmr.msra.gmra.mxu3 %vm242_vm1, %v1359_v1  ;;  %v486_v50 = vsel %vm242_vm1, %v1359_v1, 0.0 }
 0x220   :  { %v975_v4 = vpop.eup %974 }
 0x228   :  { %v358_v3 = vpop.xlane.xlu2 %357  ;;  %v327_v5 = vpop.f32.mrf.mxu3 }
 0x229   :  { %976 = vrcp.f32 %v358_v3  ;;  %v361_v6 = vmul.f32 %v975_v4, %v327_v5  ;;  %v558_v7 = vpop.permute.xlu1 %557 }
 0x22a   :  { %931 = vmatpush.xpose.msk.msrb.mxu3 %vm242_vm1, %v558_v7 }
 0x22b   :  { %929 = vmatmul.msk.f32.vlgmr.msra.gmra.mxu2 %vm242_vm1, %v361_v6 }
 0x22d   :  { %932 = vmatmul.msk.f32.vlgmr.msrb.gmra.mxu3 %vm242_vm1, %v556_v49 }
 0x22e   :  { %644 = vmatpush.msra.mxu3 %v624_v57 }
 0x22f   :  { %v977_v8 = vpop.eup %976 }
 0x230   :  { %v718_v12 = vpop.permute.xlu2 %717 }
 0x231   :  { %v350_v9 = vpop.f32.mrf.mxu0  ;;  %v586_v11 = vpop.permute.xlu1 %585 }
 0x232   :  { %v362_v10 = vmul.f32 %v977_v8, %v350_v9  ;;  %933 = vmatpush.xpose.msk.msra.mxu0 %vm242_vm1, %v586_v11 }
 0x234   :  { %930 = vmatmul.msk.f32.gmra.mxu2 %vm242_vm1, %v362_v10 }
 0x23c   :  { %940 = vmatmul.msk.f32.vlgmr.msrb.gmra.mxu2 %vm242_vm1, %v718_v12 }
 0x25b   :  { %v425_v13 = vpop.xlane.xlu1 %424 }
 0x25c   :  { %v427_v14 = vsub.f32 %v417_v59, %v425_v13 }
 0x25e   :  { %v430_v15 = vmul.f32 1.442695, %v427_v14 }
 0x260   :  { %978 = vpow2.f32 %v430_v15 }
 0x266   :  { %v979_v16 = vpop.eup %978 }
 0x267   :  { %926 = vmatmul.msk.f32.vlgmr.msrb.gmra.mxu0 %vm242_vm1, %v979_v16  ;;  %v489_v51 = vsel %vm242_vm1, %v979_v16, 0.0 }
 0x26f   :  { %934 = vmatmul.msk.f32.vlgmr.msra.gmra.mxu0 %vm242_vm1, %v584_v0 }
 0x273   :  { %v746_v36 = vpop.permute.xlu1 %745 }
 0x29f   :  { %v1371_v17 = vpop.f32.mrf.mxu3 }
 0x2ae   :  { %v1373_v18 = vpop.f32.mrf.mxu2 }
 0x2b0   :  { %v580_v19 = vpop.f32.mrf.mxu3 }
 0x2b1   :  { %v611_v20 = vsel %vm242_vm1, %v580_v19, -inf }
 0x2b2   :  { %612 = vmax.xlane.f32.xlu0 %v611_v20 }
 0x2b7   :  { %v1376_v21 = vpop.f32.mrf.mxu2 }
 0x2bf   :  { %v742_v22 = vpop.f32.mrf.mxu2 }
 0x2c0   :  { %v773_v23 = vsel %vm242_vm1, %v742_v22, -inf }
 0x2c1   :  { %774 = vmax.xlane.f32.xlu2 %v773_v23 }
 0x2c6   :  { %747 = vrot.lane.b32.xlu0 %v1308_v27, %s1188_s7 }
 0x2d9   :  { %960 = vrot.lane.b32.xlu2 %v959_v24, %s1188_s7 }
 0x2e4   :  { %v1384_v26 = vpop.f32.mrf.mxu0 }
 0x2ec   :  { %v608_v28 = vpop.f32.mrf.mxu0 }
 0x2ed   :  { %v614_v29 = vsel %vm242_vm1, %v608_v28, -inf }
 0x2f0   :  { %615 = vmax.xlane.f32.xlu0 %v614_v29 }
 0x304   :  { %649 = vrot.lane.b32.xlu0 %v1332_v39, %s1187_s5 }
 0x325   :  { %v613_v30 = vpop.xlane.xlu0 %612 }
 0x326   :  { %v617_v31 = vsub.f32 %v580_v19, %v613_v30 }
 0x328   :  { %v619_v32 = vmul.f32 1.442695, %v617_v31 }
 0x32a   :  { %980 = vpow2.f32 %v619_v32 }
 0x330   :  { %v981_v33 = vpop.eup %980 }
 0x331   :  { %935 = vmatmul.msk.f32.vlgmr.msra.gmra.mxu3 %vm242_vm1, %v981_v33  ;;  %v675_v52 = vsel %vm242_vm1, %v981_v33, 0.0 }
 0x334   :  { %v775_v27 = vpop.xlane.xlu2 %774 }
 0x335   :  { %v779_v25 = vsub.f32 %v742_v22, %v775_v27 }
 0x337   :  { %v781_v34 = vmul.f32 1.442695, %v779_v25 }
 0x338   :  { %v748_v35 = vpop.permute.xlu0 %747 }
 0x339   :  { %982 = vpow2.f32 %v781_v34  ;;  %941 = vmatpush.xpose.msk.msrb.mxu3 %vm242_vm1, %v748_v35 }
 0x33c   :  { %v961_v37 = vpop.permute.xlu2 %960  ;;  %942 = vmatmul.msk.f32.vlgmr.msrb.gmra.mxu3 %vm242_vm1, %v746_v36 }
 0x33d   :  { %v963_v38 = vunpack.i.h.bf16 %v961_v37  ;;  %v962_v46 = vunpack.i.l.bf16 %v961_v37  ;;  %869 = vmatpush.msra.mxu3 %v847_v53 }
 0x33f   :  { %v983_v39 = vpop.eup %982  ;;  %832 = vmatpush.msra.mxu2 %v963_v38 }
 0x340   :  { %v837_v40 = vsel %vm242_vm1, %v983_v39, 0.0 }
 0x341   :  { %838 = vadd.xlane.f32.xlu0 %v837_v40 }
 0x363   :  { %v616_v41 = vpop.xlane.xlu0 %615 }
 0x364   :  { %v618_v42 = vsub.f32 %v608_v28, %v616_v41  ;;  %v967_v28 = vld [vmem:[%s1433_s9] ss:$0 sm:$0xff] }
 0x366   :  { %v621_v43 = vmul.f32 1.442695, %v618_v42 }
 0x368   :  { %984 = vpow2.f32 %v621_v43 }
 0x36e   :  { %v985_v45 = vpop.eup %984 }
 0x36f   :  { %v678_v54 = vsel %vm242_vm1, %v985_v45, 0.0 }
 0x376   :  { %v650_v44 = vpop.permute.xlu0 %649 }
 0x377   :  { %670 = vmatpush.msrb.mxu0 %v650_v44 }
 0x378   :  { %936 = vmatmul.msk.f32.vlgmr.msrb.gmra.mxu0 %vm242_vm1, %v985_v45 }
 0x379   :  { %806 = vmatpush.msra.mxu0 %v962_v46 }
 0x380   :  { %943 = vmatmul.msk.f32.vlgmr.msra.gmra.mxu0 %vm242_vm1, %v983_v39 }
 0x3b4   :  { %v646_v47 = vpop.f32.mrf.mxu3  ;;  %v839_v55 = vpop.xlane.xlu0 %838 }
 0x3b5   :  { %986 = vrcp.f32 %v839_v55 }
 0x3bb   :  { %v987_v57 = vpop.eup %986 }
 0x3bf   :  { %v770_v48 = vpop.f32.mrf.mxu3 }
 0x3c0   :  { %v776_v49 = vsel %vm242_vm1, %v770_v48, -inf }
 0x3c1   :  { %777 = vmax.xlane.f32.xlu1 %v776_v49 }
 0x3c9   :  { %487 = vadd.xlane.f32.xlu1 %v486_v50 }
 0x3d1   :  { %490 = vadd.xlane.f32.xlu1 %v489_v51 }
 0x3d9   :  { %676 = vadd.xlane.f32.xlu1 %v675_v52 }
 0x3e1   :  { %679 = vadd.xlane.f32.xlu1 %v678_v54 }
 0x3f5   :  { %v672_v56 = vpop.f32.mrf.mxu0 }
 0x3fd   :  { %v808_v58 = vpop.f32.mrf.mxu0 }
 0x3fe   :  { %v845_v59 = vmul.f32 %v987_v57, %v808_v58 }
 0x400   :  { %945 = vmatmul.msk.f32.vlgmr.msra.gmra.mxu3 %vm242_vm1, %v845_v59 }
 0x434   :  { %v778_v61 = vpop.xlane.xlu1 %777 }
 0x435   :  { %v780_v62 = vsub.f32 %v770_v48, %v778_v61 }
 0x437   :  { %v783_v0 = vmul.f32 1.442695, %v780_v62 }
 0x439   :  { %988 = vpow2.f32 %v783_v0 }
 0x43c   :  { %v488_v1 = vpop.xlane.xlu1 %487 }
 0x43d   :  { %990 = vrcp.f32 %v488_v1 }
 0x43f   :  { %v989_v2 = vpop.eup %988 }
 0x440   :  { %944 = vmatmul.msk.f32.vlgmr.msra.gmra.mxu2 %vm242_vm1, %v989_v2  ;;  %v840_v3 = vsel %vm242_vm1, %v989_v2, 0.0 }
 0x441   :  { %841 = vadd.xlane.f32.xlu2 %v840_v3 }
 0x443   :  { %v991_v4 = vpop.eup %990 }
 0x444   :  { %v494_v5 = vmul.f32 %v991_v4, %v1371_v17  ;;  %v491_v6 = vpop.xlane.xlu1 %490 }
 0x445   :  { %992 = vrcp.f32 %v491_v6 }
 0x446   :  { %927 = vmatmul.msk.f32.vlgmr.msra.gmra.mxu1 %vm242_vm1, %v494_v5 }
 0x44b   :  { %v993_v7 = vpop.eup %992 }
 0x44c   :  { %v677_v8 = vpop.xlane.xlu1 %676  ;;  %v495_v9 = vmul.f32 %v993_v7, %v1384_v26 }
 0x44d   :  { %994 = vrcp.f32 %v677_v8 }
 0x44e   :  { %928 = vmatmul.msk.f32.gmra.mxu1 %vm242_vm1, %v495_v9 }
 0x453   :  { %v995_v10 = vpop.eup %994 }
 0x454   :  { %v683_v11 = vmul.f32 %v995_v10, %v646_v47  ;;  %v680_v12 = vpop.xlane.xlu1 %679 }
 0x455   :  { %996 = vrcp.f32 %v680_v12 }
 0x456   :  { %937 = vmatmul.msk.f32.vlgmr.msrb.gmra.mxu1 %vm242_vm1, %v683_v11 }
 0x45b   :  { %v997_v13 = vpop.eup %996 }
 0x45c   :  { %v684_v14 = vmul.f32 %v997_v13, %v672_v56 }
 0x45e   :  { %938 = vmatmul.msk.f32.gmra.mxu1 %vm242_vm1, %v684_v14 }
 0x483   :  { %v871_v29 = vpop.f32.mrf.mxu3 }
 0x4b4   :  { %v842_v15 = vpop.xlane.xlu2 %841 }
 0x4b5   :  { %998 = vrcp.f32 %v842_v15 }
 0x4bb   :  { %v999_v16 = vpop.eup %998 }
 0x4c3   :  { %v520_v17 = vpop.f32.mrf.mxu1  ;;  %v834_v19 = vpop.f32.mrf.mxu2 }
 0x4c4   :  { %v846_v20 = vmul.f32 %v999_v16, %v834_v19  ;;  %v550_v23 = vadd.f32 %v1373_v18, %v520_v17 }
 0x4c6   :  { %946 = vmatmul.msk.f32.gmra.mxu3 %vm242_vm1, %v846_v20 }
 0x4cb   :  { %v523_v22 = vpop.f32.mrf.mxu1 }
 0x4cc   :  { %v553_v33 = vadd.f32 %v1376_v21, %v523_v22 }
 0x4d3   :  { %v709_v24 = vpop.f32.mrf.mxu1 }
 0x4d4   :  { %v715_v26 = vadd.f32 %v709_v24, %v550_v23 }
 0x4d6   :  { %v877_v30 = vadd.f32 %v871_v29, %v715_v26 }
 0x4d8   :  { %v883_v31 = vadd.f32 %v967_v28, %v877_v30 }
 0x4da   :  { %885 = vst.msk [vmem:[#allocation13] sm:$0xff] %vm142_vm0, %v883_v31 }
 0x4db   :  { %v712_v32 = vpop.f32.mrf.mxu1 }
 0x4dc   :  { %v716_v27 = vadd.f32 %v712_v32, %v553_v33 }
 0x549   :  { %v874_v25 = vpop.f32.mrf.mxu3 }
 0x54a   :  { %v878_v18 = vadd.f32 %v874_v25, %v716_v27 }
 0x54c   :  { %v884_v34 = vadd.f32 %v967_v28, %v878_v18 }
 0x54e   :  { %886 = vst.msk [vmem:[#allocation13 + $0x8] sm:$0xff] %vm142_vm0, %v884_v34 }
 0x54f   :  { %899 = dma.vmem_to_hbm [thread:$0]  %s892_s28, 256, %s894_s11, [#allocation4], %s1179_s21, %s1179_s21, %s1180_s22  }
 0x550   :  { %1176 = dma.done.wait [#allocation4], 256  }
 0x551   :  { %1177 = vsyncadd [#allocation4], 4294967040 }
 0x552   :  { %904 = vsyncpa [#allocation3], 1 }
 0x553   :  { %905 = vsyncpa [#allocation6], 1 }
 0x554   :  { %906 = vsyncpa [#allocation9], 1 }
 0x555   :  { %907 = vsyncpa [#allocation12], 1 }
 0x556   :  { %908 = vsyncpa [#allocation4], 1 }

</bundles_post_ra>
